<compile_context>
chip_gen: v5e
topology: v5e:2x2
jax: 0.10.0
libtpu: 0.0.40
codegen_flags: <defaults>
</compile_context>

<pallas_src>
import functools

import jax
import jax.numpy as jnp
from jax import lax
from jax.experimental import pallas as pl
from jax.experimental.pallas import tpu as pltpu


def _round_up(x, m):
    return ((x + m - 1) // m) * m


def value_mlp_kernel(x_ref, w1_ref, b1_ref, w2_ref, b2_ref, w3_ref, b3_ref, o_ref):
    """One batch tile of the value MLP; batch ends up on the lane axis.

    x_ref  : (TB, state_dim)      f32   -- raw state tile, straight from HBM
    w1_ref : (hidden, state_dim)  bf16
    b1_ref : (hidden, 1)          f32
    w2_ref : (hidden, hidden)     bf16
    b2_ref : (hidden, 1)          f32
    w3_ref : (hidden, 1)          f32   -- final projection as a column (VPU/XLU path)
    b3_ref : (1, 1)               f32
    o_ref  : (1, TB)              f32   -- lane-dense value output
    """
    x_bf = x_ref[...].astype(jnp.bfloat16)

    # Layer 1: contract the feature axis of both operands -> (hidden, TB).
    # Same dot_general form as the attention q @ k^T pattern; Mosaic does the small
    # per-tile relayout in VMEM, overlapped with MXU work (no wrapper-side transpose).
    h = lax.dot_general(
        w1_ref[...], x_bf,
        dimension_numbers=(((1,), (1,)), ((), ())),
        preferred_element_type=jnp.float32)
    h = jnp.maximum(h + b1_ref[...], 0.0)

    # Layer 2: (hidden, hidden) @ (hidden, TB); cast activations to bf16 only for the dot.
    h = jnp.dot(w2_ref[...], h.astype(jnp.bfloat16), preferred_element_type=jnp.float32)
    h = jnp.maximum(h + b2_ref[...], 0.0)

    # Layer 3 (hidden -> 1): f32 VPU multiply + sublane (XLU) reduce instead of a
    # 1-output-lane MXU pass.
    v = jnp.sum(h * w3_ref[...], axis=0, keepdims=True) + b3_ref[...]
    o_ref[...] = v.astype(o_ref.dtype)


@functools.partial(jax.jit, static_argnames=("block_batch",))
def value_function_forward(state, params, *, block_batch=8192):
    """state: (B, state_dim) f32 -> (B,) f32, matching ValueFunction.forward."""
    w1, b1, w2, b2, w3, b3 = params          # PyTorch layout: W (out, in), b (out,)
    B, state_dim = state.shape
    hidden = w1.shape[0]

    # Pad the batch only to the 128-lane boundary (<=127 wasted rows).  The grid uses
    # cdiv, so a non-divisible tail tile is handled by Pallas (ragged last block),
    # rather than rounding all the way up to a multiple of TB.
    B_pad = _round_up(B, 128)
    if B_pad != B:
        state = jnp.pad(state, ((0, B_pad - B), (0, 0)))

    # Batch tile: multiple of 128, capped by block_batch (sweep 8192..16384; cap ~32768
    # on v7x to stay well inside its 64 MiB physical VMEM).
    TB = min(_round_up(block_batch, 128), B_pad)
    n_tiles = pl.cdiv(B_pad, TB)
    # Guarantee >= 2 grid steps when possible so the "parallel" batch axis can split
    # across v7x's two TensorCores instead of idling one.
    if n_tiles < 2 and B_pad >= 256:
        TB = _round_up(B_pad // 2, 128)
        n_tiles = pl.cdiv(B_pad, TB)

    # One-time weight plumbing (tiny; constant-folded / negligible under jit).
    w1_bf = w1.astype(jnp.bfloat16)
    w2_bf = w2.astype(jnp.bfloat16)
    b1_c = b1.reshape(hidden, 1).astype(jnp.float32)
    b2_c = b2.reshape(hidden, 1).astype(jnp.float32)
    w3_c = w3.reshape(hidden, 1).astype(jnp.float32)    # (1, hidden) -> column
    b3_c = b3.reshape(1, 1).astype(jnp.float32)

    def const_spec(shape):
        # Constant block index => operand stays VMEM-resident across grid steps
        # (no per-step re-DMA).  TODO(synk): could mark pipeline_mode=pl.Buffered(1)
        # once verified in MLIR; skipped here since the operands total ~3 KiB.
        return pl.BlockSpec(shape, lambda i: (0, 0))

    flops = 2 * B_pad * (state_dim * hidden + hidden * hidden + hidden)
    bytes_accessed = (
        B_pad * state_dim * 4            # f32 state stream (read directly by the kernel)
        + B_pad * 4                      # f32 value output
        + (w1_bf.size + w2_bf.size) * 2  # bf16 weights
        + (b1_c.size + b2_c.size + w3_c.size + b3_c.size) * 4
    )

    out = pl.pallas_call(
        value_mlp_kernel,
        out_shape=jax.ShapeDtypeStruct((1, B_pad), jnp.float32),
        grid=(n_tiles,),
        in_specs=[
            pl.BlockSpec((TB, state_dim), lambda i: (i, 0)),   # state tile (rows = batch)
            const_spec((hidden, state_dim)),                   # W1
            const_spec((hidden, 1)),                           # b1
            const_spec((hidden, hidden)),                      # W2
            const_spec((hidden, 1)),                           # b2
            const_spec((hidden, 1)),                           # W3 column
            const_spec((1, 1)),                                # b3
        ],
        out_specs=pl.BlockSpec((1, TB), lambda i: (0, i)),     # lane-dense output
        compiler_params=pltpu.CompilerParams(
            dimension_semantics=("parallel",),                 # 2-TC split on v7x
            vmem_limit_bytes=32 * 1024 * 1024,                 # safe on all gens incl. v7x
        ),
        cost_estimate=pl.CostEstimate(
            flops=flops, transcendentals=0, bytes_accessed=bytes_accessed),
    )(state, w1_bf, b1_c, w2_bf, b2_c, w3_c, b3_c)

    # Squeeze(-1): lane-dense (1, B_pad) -> (B,), dropping the padded batch tail.
    return out[0, :B]


def init_params(key, state_dim, hidden_dim):
    """Deterministic synthetic init, PyTorch nn.Linear layout: W (out, in), b (out,)."""
    ks = jax.random.split(key, 6)

    def lin(kw, kb, fan_in, fan_out):
        bound = 1.0 / jnp.sqrt(fan_in)
        w = jax.random.uniform(kw, (fan_out, fan_in), jnp.float32, -bound, bound)
        b = jax.random.uniform(kb, (fan_out,), jnp.float32, -bound, bound)
        return w, b

    w1, b1 = lin(ks[0], ks[1], state_dim, hidden_dim)
    w2, b2 = lin(ks[2], ks[3], hidden_dim, hidden_dim)
    w3, b3 = lin(ks[4], ks[5], hidden_dim, 1)
    return (w1, b1, w2, b2, w3, b3)


def reference_forward(state, params):
    """Pure-JAX reference with the same mixed precision (bf16 dots, f32 accumulate)."""
    w1, b1, w2, b2, w3, b3 = params
    x = state.astype(jnp.bfloat16)
    h = jnp.dot(x, w1.astype(jnp.bfloat16).T, preferred_element_type=jnp.float32) + b1
    h = jnp.maximum(h, 0.0)
    h = jnp.dot(h.astype(jnp.bfloat16), w2.astype(jnp.bfloat16).T,
                preferred_element_type=jnp.float32) + b2
    h = jnp.maximum(h, 0.0)
    v = jnp.dot(h, w3.T) + b3
    return jnp.squeeze(v, axis=-1)


if __name__ == "__main__":
    key = jax.random.PRNGKey(0)
    k_state, k_params = jax.random.split(key)

    batch, state_dim, hidden_dim = 8, 16, 32
    state = jax.random.normal(k_state, (batch, state_dim), dtype=jnp.float32)
    params = init_params(k_params, state_dim, hidden_dim)

    v = value_function_forward(state, params)
    jax.block_until_ready(v)

    v_ref = reference_forward(state, params)
    assert v.shape == (batch,), v.shape
    assert jnp.allclose(v, v_ref, atol=1e-4, rtol=1e-4), float(jnp.max(jnp.abs(v - v_ref)))

    print("KERNEL_OK")
</pallas_src>

<mosaic_0001>
module attributes {stable_mosaic.version = 11 : i64} {
  func.func @value_mlp_kernel(%arg0: i32, %arg1: memref<128x16xf32, #tpu.memory_space<vmem>>, %arg2: memref<32x16xbf16, #tpu.memory_space<vmem>>, %arg3: memref<32x1xf32, #tpu.memory_space<vmem>>, %arg4: memref<32x32xbf16, #tpu.memory_space<vmem>>, %arg5: memref<32x1xf32, #tpu.memory_space<vmem>>, %arg6: memref<32x1xf32, #tpu.memory_space<vmem>>, %arg7: memref<1x1xf32, #tpu.memory_space<vmem>>, %arg8: memref<1x128xf32, #tpu.memory_space<vmem>>) attributes {dimension_semantics = [#tpu.dimension_semantics<parallel>], iteration_bounds = array<i64: 1>, scalar_prefetch = 0 : i64, scratch_operands = 0 : i64, tpu.core_type = #tpu.core_type<tc>, window_params = [{transform_indices = @transform_0, window_bounds = array<i64: 128, 16>}, {pipeline_mode = #tpu.pipeline_mode<synchronous>, transform_indices = @transform_1, window_bounds = array<i64: 32, 16>}, {pipeline_mode = #tpu.pipeline_mode<synchronous>, transform_indices = @transform_2, window_bounds = array<i64: 32, 1>}, {pipeline_mode = #tpu.pipeline_mode<synchronous>, transform_indices = @transform_3, window_bounds = array<i64: 32, 32>}, {pipeline_mode = #tpu.pipeline_mode<synchronous>, transform_indices = @transform_4, window_bounds = array<i64: 32, 1>}, {pipeline_mode = #tpu.pipeline_mode<synchronous>, transform_indices = @transform_5, window_bounds = array<i64: 32, 1>}, {pipeline_mode = #tpu.pipeline_mode<synchronous>, transform_indices = @transform_6, window_bounds = array<i64: 1, 1>}, {transform_indices = @transform_7, window_bounds = array<i64: 1, 128>}]} {
    %c0 = arith.constant 0 : index
    %c0_0 = arith.constant 0 : index
    %0 = vector.load %arg1[%c0, %c0_0] : memref<128x16xf32, #tpu.memory_space<vmem>>, vector<128x16xf32>
    %1 = arith.truncf %0 : vector<128x16xf32> to vector<128x16xbf16>
    %c0_1 = arith.constant 0 : index
    %c0_2 = arith.constant 0 : index
    %2 = vector.load %arg2[%c0_1, %c0_2] : memref<32x16xbf16, #tpu.memory_space<vmem>>, vector<32x16xbf16>
    %cst = arith.constant dense<0.000000e+00> : vector<32x128xf32>
    %3 = tpu.matmul %2, %1, %cst {dimension_numbers = #tpu.dot_dimension_numbers<[1], [1], [0], [0], [0, 0, 1, 0], [], []>} : vector<32x16xbf16>, vector<128x16xbf16>, vector<32x128xf32> -> vector<32x128xf32>
    %c0_3 = arith.constant 0 : index
    %c0_4 = arith.constant 0 : index
    %4 = vector.load %arg3[%c0_3, %c0_4] : memref<32x1xf32, #tpu.memory_space<vmem>>, vector<32x1xf32>
    %5 = vector.broadcast %4 : vector<32x1xf32> to vector<32x128xf32>
    %6 = arith.addf %3, %5 : vector<32x128xf32>
    %cst_5 = arith.constant 0.000000e+00 : f32
    %7 = vector.broadcast %cst_5 : f32 to vector<32x128xf32>
    %8 = arith.maximumf %6, %7 : vector<32x128xf32>
    %c0_6 = arith.constant 0 : index
    %c0_7 = arith.constant 0 : index
    %9 = vector.load %arg4[%c0_6, %c0_7] : memref<32x32xbf16, #tpu.memory_space<vmem>>, vector<32x32xbf16>
    %10 = arith.truncf %8 : vector<32x128xf32> to vector<32x128xbf16>
    %cst_8 = arith.constant dense<0.000000e+00> : vector<32x128xf32>
    %11 = tpu.matmul %9, %10, %cst_8 {dimension_numbers = #tpu.dot_dimension_numbers<[1], [0], [0], [1], [0, 0, 1, 1], [], []>} : vector<32x32xbf16>, vector<32x128xbf16>, vector<32x128xf32> -> vector<32x128xf32>
    %c0_9 = arith.constant 0 : index
    %c0_10 = arith.constant 0 : index
    %12 = vector.load %arg5[%c0_9, %c0_10] : memref<32x1xf32, #tpu.memory_space<vmem>>, vector<32x1xf32>
    %13 = vector.broadcast %12 : vector<32x1xf32> to vector<32x128xf32>
    %14 = arith.addf %11, %13 : vector<32x128xf32>
    %cst_11 = arith.constant 0.000000e+00 : f32
    %15 = vector.broadcast %cst_11 : f32 to vector<32x128xf32>
    %16 = arith.maximumf %14, %15 : vector<32x128xf32>
    %c0_12 = arith.constant 0 : index
    %c0_13 = arith.constant 0 : index
    %17 = vector.load %arg6[%c0_12, %c0_13] : memref<32x1xf32, #tpu.memory_space<vmem>>, vector<32x1xf32>
    %18 = vector.broadcast %17 : vector<32x1xf32> to vector<32x128xf32>
    %19 = arith.mulf %16, %18 : vector<32x128xf32>
    %cst_14 = arith.constant dense<0.000000e+00> : vector<128xf32>
    %20 = vector.multi_reduction <add>, %19, %cst_14 [0] : vector<32x128xf32> to vector<128xf32>
    %21 = vector.shape_cast %20 : vector<128xf32> to vector<1x128xf32>
    %c0_15 = arith.constant 0 : index
    %c0_16 = arith.constant 0 : index
    %22 = vector.load %arg7[%c0_15, %c0_16] : memref<1x1xf32, #tpu.memory_space<vmem>>, vector<1x1xf32>
    %23 = vector.broadcast %22 : vector<1x1xf32> to vector<1x128xf32>
    %24 = arith.addf %21, %23 : vector<1x128xf32>
    %c0_17 = arith.constant 0 : index
    %c0_18 = arith.constant 0 : index
    %25 = vector.load %arg8[%c0_17, %c0_18] : memref<1x128xf32, #tpu.memory_space<vmem>>, vector<1x128xf32>
    tpu.vector_store %arg8[%c0_17, %c0_18], %24 {strides = array<i32>} : memref<1x128xf32, #tpu.memory_space<vmem>>, vector<1x128xf32>,
    return
  }
  func.func @transform_0(%arg0: i32) -> (i32, i32) {
    %c0_i32 = arith.constant 0 : i32
    %c0_i32_0 = arith.constant 0 : i32
    return %arg0, %c0_i32 : i32, i32
  }
  func.func @transform_1(%arg0: i32) -> (i32, i32) {
    %c0_i32 = arith.constant 0 : i32
    %c0_i32_0 = arith.constant 0 : i32
    %c0_i32_1 = arith.constant 0 : i32
    return %c0_i32, %c0_i32_0 : i32, i32
  }
  func.func @transform_2(%arg0: i32) -> (i32, i32) {
    %c0_i32 = arith.constant 0 : i32
    %c0_i32_0 = arith.constant 0 : i32
    %c0_i32_1 = arith.constant 0 : i32
    return %c0_i32, %c0_i32_0 : i32, i32
  }
  func.func @transform_3(%arg0: i32) -> (i32, i32) {
    %c0_i32 = arith.constant 0 : i32
    %c0_i32_0 = arith.constant 0 : i32
    %c0_i32_1 = arith.constant 0 : i32
    return %c0_i32, %c0_i32_0 : i32, i32
  }
  func.func @transform_4(%arg0: i32) -> (i32, i32) {
    %c0_i32 = arith.constant 0 : i32
    %c0_i32_0 = arith.constant 0 : i32
    %c0_i32_1 = arith.constant 0 : i32
    return %c0_i32, %c0_i32_0 : i32, i32
  }
  func.func @transform_5(%arg0: i32) -> (i32, i32) {
    %c0_i32 = arith.constant 0 : i32
    %c0_i32_0 = arith.constant 0 : i32
    %c0_i32_1 = arith.constant 0 : i32
    return %c0_i32, %c0_i32_0 : i32, i32
  }
  func.func @transform_6(%arg0: i32) -> (i32, i32) {
    %c0_i32 = arith.constant 0 : i32
    %c0_i32_0 = arith.constant 0 : i32
    %c0_i32_1 = arith.constant 0 : i32
    return %c0_i32, %c0_i32_0 : i32, i32
  }
  func.func @transform_7(%arg0: i32) -> (i32, i32) {
    %c0_i32 = arith.constant 0 : i32
    %c0_i32_0 = arith.constant 0 : i32
    return %c0_i32, %arg0 : i32, i32
  }
}

</mosaic_0001>

<bundles_post_ra>
// kernel: value_function_forward.1
= control target key start
LH: loop header
LB: loop body
LE: loop exit
PB: predicated region body
PF: predicated region fallthrough
CT: control target
= control target key end

     0   :  { %vm91_vm0 = vcmask 130048   ;;  %v301_v12 = vmov 0   ;;  %vm185_vm1 = vcmask 261120   ;;  %s454_s0 = inlined_call_operand.vmem [shape: f32[128,16], index: 0, kind: input, shape index: {}]   ;;  %s455_s2 = inlined_call_operand.vmem [shape: f32[32,1], index: 2, kind: input, shape index: {}]   ;;  %s456_s4 = inlined_call_operand.vmem [shape: f32[32,1], index: 4, kind: input, shape index: {}]   ;;  %s457_s6 = inlined_call_operand.<no memory space> [shape: f32[1,1], index: 6, kind: input, shape index: {}]   ;;  %s458_s5 = inlined_call_operand.vmem [shape: f32[32,1], index: 5, kind: input, shape index: {}]   ;;  %s459_s1 = inlined_call_operand.vmem [shape: bf16[32,16], index: 1, kind: input, shape index: {}]   ;;  %s460_s3 = inlined_call_operand.vmem [shape: bf16[32,32], index: 3, kind: input, shape index: {}]   ;;  %s461_s7 = inlined_call_operand.vmem [shape: f32[1,128], index: 7, kind: output, shape index: {}]  }
   0x1   :  { %v43_v0 = vld [vmem:[%s454_s0 + $0x70] sm:$0xff]  ;;  %v44_v1 = vld [vmem:[%s454_s0 + $0x78] sm:$0xff]  ;;  %v41_v3 = vld [vmem:[%s454_s0 + $0x60] sm:$0xff]  ;;  %298 = vset.pattern.permute.xlu0 %v301_v12  ;;  %299 = vset.pattern.permute.xlu1 %v301_v12  ;;  %v12_v28 = vstv %s457_s6 }
   0x2   :  { %v52_v2 = vpack.c.bf16 %v44_v1, %v43_v0  ;;  %v42_v4 = vld [vmem:[%s454_s0 + $0x68] sm:$0xff]  ;;  %v39_v8 = vld [vmem:[%s454_s0 + $0x50] sm:$0xff]  ;;  %v40_v9 = vld [vmem:[%s454_s0 + $0x58] sm:$0xff]  ;;  %300 = vset.pattern.permute.xlu2 %v301_v12  ;;  %13 = vst [vmem:[#allocation2] sm:$0x1] %v12_v28 }
   0x3   :  { %v51_v6 = vpack.c.bf16 %v42_v4, %v41_v3  ;;  %v59_v10 = vld [vmem:[%s455_s2 + $0x10] sm:$0xff]  ;;  %v50_v11 = vpack.c.bf16 %v40_v9, %v39_v8  ;;  %v37_v14 = vld [vmem:[%s454_s0 + $0x40] sm:$0xff]  ;;  %v38_v15 = vld [vmem:[%s454_s0 + $0x48] sm:$0xff] }
   0x4   :  { %v120_v5 = vsel %vm91_vm0, %v52_v2, 0  ;;  %73 = vperm.xlu0 %298, %v59_v10   ;;  %v60_v16 = vld [vmem:[%s455_s2 + $0x18] sm:$0xff]  ;;  %v49_v17 = vpack.c.bf16 %v38_v15, %v37_v14  ;;  %v35_v19 = vld [vmem:[%s454_s0 + $0x30] sm:$0xff]  ;;  %v57_v21 = vld [vmem:[%s455_s2] sm:$0xff] }
   0x5   :  { %289 = vmatpush.bf16.xpose.msra.mxu2 %v120_v5  ;;  %122 = vmatpush.bf16.xpose.msra.mxu0 %v120_v5  ;;  %v117_v7 = vsel %vm91_vm0, %v51_v6, 0  ;;  %v114_v13 = vsel %vm91_vm0, %v50_v11, 0  ;;  %v36_v20 = vld [vmem:[%s454_s0 + $0x38] sm:$0xff]  ;;  %v33_v24 = vld [vmem:[%s454_s0 + $0x20] sm:$0xff]  ;;  %v34_v25 = vld [vmem:[%s454_s0 + $0x28] sm:$0xff] }
   0x6   :  { %v111_v18 = vsel %vm91_vm0, %v49_v17, 0  ;;  %v48_v22 = vpack.c.bf16 %v36_v20, %v35_v19  ;;  %63 = vperm.xlu1 %299, %v57_v21   ;;  %v153_v26 = vld [vmem:[%s456_s4 + $0x10] sm:$0xff]  ;;  %v58_v27 = vld [vmem:[%s455_s2 + $0x8] sm:$0xff]  ;;  %v47_v29 = vpack.c.bf16 %v34_v25, %v33_v24  ;;  %v32_v32 = vld [vmem:[%s454_s0 + $0x18] sm:$0xff] }
   0x7   :  { %v31_v31 = vld [vmem:[%s454_s0 + $0x10] sm:$0xff]  ;;  %v216_v33 = vld [vmem:[%s458_s5 + $0x8] sm:$0xff]  ;;  %v154_v34 = vld [vmem:[%s456_s4 + $0x18] sm:$0xff] }
   0x8   :  { %v108_v23 = vsel %vm91_vm0, %v48_v22, 0  ;;  %v105_v30 = vsel %vm91_vm0, %v47_v29, 0  ;;  %v46_v35 = vpack.c.bf16 %v32_v32, %v31_v31  ;;  %v29_v37 = vld [vmem:[%s454_s0] sm:$0xff]  ;;  %v30_v38 = vld [vmem:[%s454_s0 + $0x8] sm:$0xff]  ;;  %v217_v40 = vld [vmem:[%s458_s5 + $0x10] sm:$0xff] }
   0x9   :  { %v252_v39 = vld [vmem:[#allocation2] sm:$0x1]  ;;  %v45_v41 = vpack.c.bf16 %v30_v38, %v29_v37  ;;  %v286_v43 = vld [vmem:[%s459_s1 + $0x8] sm:$0xff]  ;;  %v218_v3 = vld [vmem:[%s458_s5 + $0x18] sm:$0xff] }
   0xa   :  { %v102_v36 = vsel %vm91_vm0, %v46_v35, 0  ;;  %v285_v44 = vld [vmem:[%s459_s1] sm:$0xff]  ;;  %v152_v51 = vld [vmem:[%s456_s4 + $0x8] sm:$0xff] }
   0xb   :  { %v99_v42 = vsel %vm91_vm0, %v45_v41, 0  ;;  %v151_v45 = vld [vmem:[%s456_s4] sm:$0xff]  ;;  %v288_v4 = vld [vmem:[%s460_s3 + $0x8] sm:$0xff] }
   0xc   :  { %78 = vperm.xlu0 %298, %v60_v16   ;;  %157 = vperm.xlu2 %300, %v151_v45   ;;  %v215_v61 = vld [vmem:[%s458_s5] sm:$0xff] }
   0xd   :  { %290 = vmatpush.bf16.xpose.msra.mxu2 %v117_v7  ;;  %123 = vmatpush.bf16.xpose.msra.mxu0 %v117_v7  ;;  %v287_v2 = vld [vmem:[%s460_s3] sm:$0xff] }
   0xe   :  { %68 = vperm.xlu1 %299, %v58_v27  }
  0x14   :  { %167 = vperm.xlu0 %298, %v153_v26   ;;  %162 = vperm.xlu2 %300, %v152_v51  }
  0x15   :  { %291 = vmatpush.bf16.xpose.msra.mxu2 %v114_v13  ;;  %124 = vmatpush.bf16.xpose.msra.mxu0 %v114_v13 }
  0x16   :  { %172 = vperm.xlu1 %299, %v154_v34  }
  0x1c   :  { %226 = vperm.xlu0 %298, %v216_v33   ;;  %221 = vperm.xlu2 %300, %v215_v61  }
  0x1d   :  { %292 = vmatpush.bf16.xpose.msra.mxu2 %v111_v18  ;;  %125 = vmatpush.bf16.xpose.msra.mxu0 %v111_v18 }
  0x1e   :  { %231 = vperm.xlu1 %299, %v217_v40  }
  0x24   :  { %255 = vperm.xlu0 %298, %v252_v39   ;;  %236 = vperm.xlu2 %300, %v218_v3  }
  0x25   :  { %293 = vmatpush.bf16.xpose.msra.mxu2 %v108_v23  ;;  %126 = vmatpush.bf16.xpose.msra.mxu0 %v108_v23 }
  0x2d   :  { %294 = vmatpush.bf16.xpose.msra.mxu2 %v105_v30  ;;  %127 = vmatpush.bf16.xpose.msra.mxu0 %v105_v30 }
  0x35   :  { %295 = vmatpush.bf16.xpose.msra.mxu2 %v102_v36  ;;  %128 = vmatpush.bf16.xpose.msra.mxu0 %v102_v36 }
  0x3d   :  { %296 = vmatpush.bf16.xpose.msra.mxu2 %v99_v42  ;;  %129 = vmatpush.bf16.xpose.msra.mxu0 %v99_v42 }
  0x44   :  { %274 = vmatmul.msk.bf16.vlgmr.msra.gmra.mxu2 %vm91_vm0, %v286_v43  ;;  %273 = vmatmul.msk.bf16.vlgmr.msra.gmra.mxu0 %vm91_vm0, %v285_v44 }
  0x66   :  { %v158_v5 = vpop.permute.xlu2 %157 }
  0x6e   :  { %v163_v7 = vpop.permute.xlu2 %162 }
  0x76   :  { %v74_v47 = vpop.permute.xlu0 %73  ;;  %v222_v15 = vpop.permute.xlu2 %221 }
  0x78   :  { %v64_v48 = vpop.permute.xlu1 %63 }
  0x7e   :  { %v79_v52 = vpop.permute.xlu0 %78  ;;  %v237_v28 = vpop.permute.xlu2 %236 }
  0x80   :  { %v69_v54 = vpop.permute.xlu1 %68 }
  0x86   :  { %v168_v9 = vpop.permute.xlu0 %167 }
  0x88   :  { %v173_v10 = vpop.permute.xlu1 %172 }
  0x8e   :  { %v227_v19 = vpop.permute.xlu0 %226 }
  0x90   :  { %v232_v21 = vpop.permute.xlu1 %231 }
  0x96   :  { %v256_v36 = vpop.permute.xlu0 %255 }
  0x97   :  { %v258_v38 = vperm.slane %v256_v36, 0 }
  0xc1   :  { %v131_v46 = vpop.f32.mrf.mxu0 }
  0xc2   :  { %v132_v56 = vadd.f32 %v131_v46, %v64_v48 }
  0xc4   :  { %v141_v62 = vmax.f32 %v132_v56, 0.0 }
  0xc7   :  { %v136_v49 = vpop.f32.mrf.mxu2 }
  0xc8   :  { %v137_v53 = vadd.f32 %v136_v49, %v74_v47 }
  0xc9   :  { %v133_v50 = vpop.f32.mrf.mxu0 }
  0xca   :  { %v134_v57 = vadd.f32 %v133_v50, %v69_v54  ;;  %v143_v59 = vmax.f32 %v137_v53, 0.0 }
  0xcc   :  { %v142_v63 = vmax.f32 %v134_v57, 0.0 }
  0xce   :  { %v149_v1 = vpack.c.bf16 %v142_v63, %v141_v62 }
  0xcf   :  { %v138_v55 = vpop.f32.mrf.mxu2 }
  0xd0   :  { %v139_v58 = vadd.f32 %v138_v55, %v79_v52 }
  0xd2   :  { %v144_v60 = vmax.f32 %v139_v58, 0.0 }
  0xd4   :  { %v150_v0 = vpack.c.bf16 %v144_v60, %v143_v59 }
  0xd6   :  { %198 = vmatpush.bf16.msra.mxu1 %v150_v0 }
  0xda   :  { %199 = vmatpush.bf16.msra.mxu1 %v149_v1 }
  0xdd   :  { %283 = vmatmul.msk.bf16.vlgmr.msra.gmra.mxu1 %vm185_vm1, %v287_v2 }
  0xed   :  { %284 = vmatmul.msk.bf16.gmra.mxu1 %vm185_vm1, %v288_v4 }
 0x15a   :  { %v201_v6 = vpop.f32.mrf.mxu1 }
 0x15b   :  { %v202_v13 = vadd.f32 %v201_v6, %v158_v5 }
 0x15d   :  { %v211_v17 = vmax.f32 %v202_v13, 0.0 }
 0x15f   :  { %v239_v23 = vmul.f32 %v222_v15, %v211_v17 }
 0x162   :  { %v203_v8 = vpop.f32.mrf.mxu1 }
 0x163   :  { %v204_v11 = vadd.f32 %v203_v8, %v163_v7 }
 0x165   :  { %v212_v16 = vmax.f32 %v204_v11, 0.0 }
 0x167   :  { %v240_v20 = vmul.f32 %v227_v19, %v212_v16 }
 0x169   :  { %v243_v26 = vadd.f32 %v240_v20, %v239_v23 }
 0x16a   :  { %v206_v12 = vpop.f32.mrf.mxu1 }
 0x16b   :  { %v207_v14 = vadd.f32 %v206_v12, %v168_v9 }
 0x16d   :  { %v213_v18 = vmax.f32 %v207_v14, 0.0 }
 0x16f   :  { %v241_v24 = vmul.f32 %v232_v21, %v213_v18 }
 0x171   :  { %v244_v29 = vadd.f32 %v243_v26, %v241_v24 }
 0x172   :  { %v208_v22 = vpop.f32.mrf.mxu1 }
 0x173   :  { %v209_v25 = vadd.f32 %v208_v22, %v173_v10 }
 0x175   :  { %v214_v27 = vmax.f32 %v209_v25, 0.0 }
 0x177   :  { %v242_v30 = vmul.f32 %v237_v28, %v214_v27 }
 0x179   :  { %v245_v31 = vadd.f32 %v244_v29, %v242_v30 }
 0x17b   :  { %v246_v32 = vrot.slane %v245_v31, 4 }
 0x17d   :  { %v247_v33 = vadd.f32 %v246_v32, %v245_v31 }
 0x17f   :  { %v248_v34 = vrot.slane %v247_v33, 2 }
 0x181   :  { %v249_v35 = vadd.f32 %v248_v34, %v247_v33 }
 0x183   :  { %v250_v37 = vrot.slane %v249_v35, 1 }
 0x185   :  { %v251_v39 = vadd.f32 %v250_v37, %v249_v35 }
 0x187   :  { %v259_v40 = vadd.f32 %v258_v38, %v251_v39 }
 0x189   :  { %260 = vst [vmem:[%s461_s7] sm:$0x1] %v259_v40 }

</bundles_post_ra>
